<compile_context>
chip_gen: v5e
topology: v5e:2x2
jax: 0.10.0
libtpu: 0.0.40
codegen_flags: <defaults>
</compile_context>

<pallas_src>
import functools
import math

import jax
import jax.numpy as jnp
from jax.experimental import pallas as pl
from jax.experimental.pallas import tpu as pltpu


def _rope_cache_kernel(inv_freq_ref, col_off_ref, cos_ref, sin_ref, *, pack):
    """One tile of the packed rotary cache.

    inv_freq_ref : (1, width)  -- cat([f, f], -1) tiled `pack` times
    col_off_ref  : (1, width)  -- float32(col // emb_dim)  (0..pack-1)
    cos_ref/sin_ref : (tile_rows, width) physical tile.  Element (r, c) holds
      logical entry (position = (tile_origin + r) * pack + c // emb_dim,
                     feature  = c %  emb_dim).
    """
    rows, width = cos_ref.shape
    tile_origin = pl.program_id(0) * rows
    row = jax.lax.broadcasted_iota(jnp.int32, (rows, width), 0)
    # exact integer base position, cast to f32 only at the end
    base_pos = ((tile_origin + row) * pack).astype(jnp.float32)
    pos = base_pos + col_off_ref[...]
    ang = pos * inv_freq_ref[...]
    # NOTE: both halves of each emb block are identical; the duplicated
    # cos/sin work is kept because the kernel is HBM-store-bound and the
    # packed lane-dense layout makes a half-width compute + duplicate write
    # cost more in cross-lane shuffles than it saves on the EUP.
    cos_ref[...] = jnp.cos(ang)
    sin_ref[...] = jnp.sin(ang)


@functools.partial(jax.jit, static_argnames=("n_phys_rows", "tile_rows", "pack"))
def _build_rope_cache(inv_freq_row, col_off_row, *, n_phys_rows, tile_rows, pack):
    """Build the packed (n_phys_rows, pack*emb_dim) f32 cos/sin caches."""
    width = inv_freq_row.shape[1]
    grid = (n_phys_rows // tile_rows,)
    kernel = functools.partial(_rope_cache_kernel, pack=pack)
    cos, sin = pl.pallas_call(
        kernel,
        out_shape=(
            jax.ShapeDtypeStruct((n_phys_rows, width), jnp.float32),
            jax.ShapeDtypeStruct((n_phys_rows, width), jnp.float32),
        ),
        grid_spec=pltpu.PrefetchScalarGridSpec(
            num_scalar_prefetch=0,
            grid=grid,
            in_specs=[
                pl.BlockSpec((1, width), lambda i: (0, 0)),
                pl.BlockSpec((1, width), lambda i: (0, 0)),
            ],
            out_specs=[
                pl.BlockSpec((tile_rows, width), lambda i: (i, 0)),
                pl.BlockSpec((tile_rows, width), lambda i: (i, 0)),
            ],
        ),
        compiler_params=pltpu.CompilerParams(
            dimension_semantics=("parallel",),
        ),
    )(inv_freq_row, col_off_row)
    return cos, sin


def _choose_tiling(seq_len, emb_dim, *, target_lanes=512, target_positions=2048,
                   max_block_bytes=2 << 20):
    """Pick (pack, tile_rows): lane-dense width and large-but-bounded tiles."""
    g = math.gcd(emb_dim, 128)
    pack = 128 // g                                   # minimal lane-aligned pack
    pack *= max(1, target_lanes // (pack * emb_dim))  # widen toward ~512 lanes
    width = pack * emb_dim
    min_positions = pack * 8                          # one 8-sublane tile
    needed = -(-max(seq_len, 1) // min_positions) * min_positions

    tile_rows = max(8, target_positions // pack) // 8 * 8
    # VMEM cap: 2 outputs x 2 pipeline buffers per block, keep well under the
    # smallest scoped-VMEM default (v5e: 16 MiB).
    tile_rows = min(tile_rows, max(8, (max_block_bytes // (width * 4)) // 8 * 8))
    # Keep >= ~4 grid steps when the cache is big enough (v7x megacore).
    tile_rows = min(tile_rows, max(8, (needed // (pack * 4)) // 8 * 8))
    # Never build a tile bigger than the (padded) cache itself.
    tile_rows = min(tile_rows, needed // pack)
    return pack, tile_rows


class RotaryEmbedding:
    """JAX/Pallas port of the PyTorch RotaryEmbedding module."""

    def __init__(self, dim: int, max_position_embeddings: int = 16384,
                 base: int = 10000):
        self.dim = dim
        self.max_position_embeddings = max_position_embeddings
        self.base = base
        # inv_freq = 1 / base ** (arange(0, dim, 2) / dim)
        self.inv_freq = 1.0 / (
            self.base ** (jnp.arange(0, self.dim, 2, dtype=jnp.float32) / self.dim)
        )
        self.emb_dim = 2 * int(self.inv_freq.shape[0])  # width of cat([f, f])
        self._cast_cache = {}
        self._set_cos_sin_cache(max_position_embeddings)

    def _set_cos_sin_cache(self, seq_len: int):
        self.max_seq_len_cached = seq_len
        emb_dim = self.emb_dim

        pack, tile_rows = _choose_tiling(seq_len, emb_dim)
        width = pack * emb_dim
        positions_per_tile = pack * tile_rows
        padded_seq = -(-seq_len // positions_per_tile) * positions_per_tile
        n_phys_rows = padded_seq // pack

        # cat([f, f], -1) tiled `pack` times: per-lane frequency for the packed row
        inv_freq_full = jnp.concatenate([self.inv_freq, self.inv_freq])
        inv_freq_row = jnp.tile(inv_freq_full, pack)[None, :]
        # per-lane position offset within a packed physical row (0..pack-1)
        col_off_row = (
            jnp.arange(width, dtype=jnp.int32) // emb_dim
        ).astype(jnp.float32)[None, :]

        cos_p, sin_p = _build_rope_cache(
            inv_freq_row, col_off_row,
            n_phys_rows=n_phys_rows, tile_rows=tile_rows, pack=pack,
        )
        # free row-major reshape back to the logical [seq, emb_dim] layout
        cos = cos_p.reshape(padded_seq, emb_dim)[:seq_len]
        sin = sin_p.reshape(padded_seq, emb_dim)[:seq_len]
        self.cos_cached = cos
        self.sin_cached = sin
        # per-dtype cast cache so __call__ never re-casts on the hot path
        self._cast_cache = {jnp.dtype(jnp.float32): (cos, sin)}

    def _get_cast_cache(self, dtype):
        key = jnp.dtype(dtype)
        cached = self._cast_cache.get(key)
        if cached is None:
            cached = (self.cos_cached.astype(key), self.sin_cached.astype(key))
            self._cast_cache[key] = cached
        return cached

    def __call__(self, x, seq_len=None):
        if seq_len is not None and seq_len > self.max_seq_len_cached:
            self._set_cos_sin_cache(seq_len)
        if seq_len is None:
            seq_len = x.shape[1]
        cos, sin = self._get_cast_cache(x.dtype)
        if seq_len == self.max_seq_len_cached:
            return cos, sin
        return cos[:seq_len], sin[:seq_len]


if __name__ == "__main__":
    key = jax.random.PRNGKey(0)
    batch, seq, dim = 2, 8, 64
    # x is only used for its shape[1] and dtype in the forward pass
    x = jax.random.normal(key, (batch, seq, dim), dtype=jnp.float32)

    rope = RotaryEmbedding(dim=dim, max_position_embeddings=128)
    cos, sin = rope(x)  # seq_len inferred from x.shape[1]
    cos = jax.block_until_ready(cos)
    sin = jax.block_until_ready(sin)

    # sanity check against a pure-JAX reference (small positions -> tight tol)
    t = jnp.arange(seq, dtype=jnp.float32)
    freqs = jnp.einsum("i,j->ij", t, rope.inv_freq)
    emb = jnp.concatenate([freqs, freqs], axis=-1)
    assert cos.shape == (seq, dim) and sin.shape == (seq, dim)
    assert jnp.allclose(cos, jnp.cos(emb), atol=1e-5)
    assert jnp.allclose(sin, jnp.sin(emb), atol=1e-5)

    # dtype path: per-dtype cache, no recurring astype work in the kernel path
    cos_b, sin_b = rope(x.astype(jnp.bfloat16))
    assert cos_b.dtype == jnp.bfloat16 and sin_b.dtype == jnp.bfloat16
    assert cos_b.shape == (seq, dim)

    # multi-tile / packed-layout coverage (4096 positions -> 4 grid steps).
    # Coarse tolerance: cos/sin of large angles may differ by a few ULPs
    # between implementations; an indexing/packing bug would be O(1).
    rope_big = RotaryEmbedding(dim=dim, max_position_embeddings=4096)
    t2 = jnp.arange(4096, dtype=jnp.float32)
    freqs2 = jnp.einsum("i,j->ij", t2, rope_big.inv_freq)
    emb2 = jnp.concatenate([freqs2, freqs2], axis=-1)
    cos_big = jax.block_until_ready(rope_big.cos_cached)
    sin_big = jax.block_until_ready(rope_big.sin_cached)
    assert cos_big.shape == (4096, dim)
    assert jnp.allclose(cos_big, jnp.cos(emb2), atol=1e-3)
    assert jnp.allclose(sin_big, jnp.sin(emb2), atol=1e-3)

    print("KERNEL_OK")
</pallas_src>

<mosaic_0001>
module attributes {stable_mosaic.version = 11 : i64} {
  func.func @_rope_cache_kernel(%arg0: i32, %arg1: memref<1x512xf32, #tpu.memory_space<vmem>>, %arg2: memref<1x512xf32, #tpu.memory_space<vmem>>, %arg3: memref<8x512xf32, #tpu.memory_space<vmem>>, %arg4: memref<8x512xf32, #tpu.memory_space<vmem>>) attributes {dimension_semantics = [#tpu.dimension_semantics<parallel>], iteration_bounds = array<i64: 2>, scalar_prefetch = 0 : i64, scratch_operands = 0 : i64, tpu.core_type = #tpu.core_type<tc>, window_params = [{pipeline_mode = #tpu.pipeline_mode<synchronous>, transform_indices = @transform_0, window_bounds = array<i64: 1, 512>}, {pipeline_mode = #tpu.pipeline_mode<synchronous>, transform_indices = @transform_1, window_bounds = array<i64: 1, 512>}, {transform_indices = @transform_2, window_bounds = array<i64: 8, 512>}, {transform_indices = @transform_3, window_bounds = array<i64: 8, 512>}]} {
    %c8_i32 = arith.constant 8 : i32
    %0 = arith.muli %arg0, %c8_i32 : i32
    %1 = tpu.iota {dimensions = array<i32: 0>} : vector<8x512xi32>
    %2 = vector.broadcast %0 : i32 to vector<8x512xi32>
    %3 = arith.addi %2, %1 : vector<8x512xi32>
    %c8_i32_0 = arith.constant 8 : i32
    %4 = vector.broadcast %c8_i32_0 : i32 to vector<8x512xi32>
    %5 = arith.muli %3, %4 : vector<8x512xi32>
    %6 = arith.sitofp %5 : vector<8x512xi32> to vector<8x512xf32>
    %c0 = arith.constant 0 : index
    %c0_1 = arith.constant 0 : index
    %7 = vector.load %arg2[%c0, %c0_1] : memref<1x512xf32, #tpu.memory_space<vmem>>, vector<1x512xf32>
    %8 = vector.broadcast %7 : vector<1x512xf32> to vector<8x512xf32>
    %9 = arith.addf %6, %8 : vector<8x512xf32>
    %c0_2 = arith.constant 0 : index
    %c0_3 = arith.constant 0 : index
    %10 = vector.load %arg1[%c0_2, %c0_3] : memref<1x512xf32, #tpu.memory_space<vmem>>, vector<1x512xf32>
    %11 = vector.broadcast %10 : vector<1x512xf32> to vector<8x512xf32>
    %12 = arith.mulf %9, %11 : vector<8x512xf32>
    %13 = math.cos %12 : vector<8x512xf32>
    %c0_4 = arith.constant 0 : index
    %c0_5 = arith.constant 0 : index
    %14 = vector.load %arg3[%c0_4, %c0_5] : memref<8x512xf32, #tpu.memory_space<vmem>>, vector<8x512xf32>
    tpu.vector_store %arg3[%c0_4, %c0_5], %13 {strides = array<i32>} : memref<8x512xf32, #tpu.memory_space<vmem>>, vector<8x512xf32>,
    %15 = math.sin %12 : vector<8x512xf32>
    %c0_6 = arith.constant 0 : index
    %c0_7 = arith.constant 0 : index
    %16 = vector.load %arg4[%c0_6, %c0_7] : memref<8x512xf32, #tpu.memory_space<vmem>>, vector<8x512xf32>
    tpu.vector_store %arg4[%c0_6, %c0_7], %15 {strides = array<i32>} : memref<8x512xf32, #tpu.memory_space<vmem>>, vector<8x512xf32>,
    return
  }
  func.func @transform_0(%arg0: i32) -> (i32, i32) {
    %c0_i32 = arith.constant 0 : i32
    %c0_i32_0 = arith.constant 0 : i32
    %c0_i32_1 = arith.constant 0 : i32
    return %c0_i32, %c0_i32_0 : i32, i32
  }
  func.func @transform_1(%arg0: i32) -> (i32, i32) {
    %c0_i32 = arith.constant 0 : i32
    %c0_i32_0 = arith.constant 0 : i32
    %c0_i32_1 = arith.constant 0 : i32
    return %c0_i32, %c0_i32_0 : i32, i32
  }
  func.func @transform_2(%arg0: i32) -> (i32, i32) {
    %c0_i32 = arith.constant 0 : i32
    %c0_i32_0 = arith.constant 0 : i32
    return %arg0, %c0_i32 : i32, i32
  }
  func.func @transform_3(%arg0: i32) -> (i32, i32) {
    %c0_i32 = arith.constant 0 : i32
    %c0_i32_0 = arith.constant 0 : i32
    return %arg0, %c0_i32 : i32, i32
  }
}

</mosaic_0001>

<bundles_post_ra>
// kernel: _build_rope_cache.1
= control target key start
LH: loop header
LB: loop body
LE: loop exit
PB: predicated region body
PF: predicated region fallthrough
CT: control target
= control target key end

     0   :  { %9 = vsyncpa [#allocation3], 0  ;;  %s2538_s0 = inlined_call_operand.hbm [shape: f32[1,512], index: 0, kind: input, shape index: {}]   ;;  %s2539_s1 = inlined_call_operand.hbm [shape: f32[1,512], index: 1, kind: input, shape index: {}]   ;;  %s2540_s2 = inlined_call_operand.hbm [shape: f32[16,512], index: 2, kind: output, shape index: {0}]   ;;  %s2541_s3 = inlined_call_operand.hbm [shape: f32[16,512], index: 3, kind: output, shape index: {1}]  }
   0x1   :  { %10 = vsyncpa [#allocation6], 0 }
   0x2   :  { %11 = vsyncpa [#allocation4], 0 }
   0x3   :  { %13 = vsyncpa [#allocation4 + $0x1], 0 }
   0x4   :  { %14 = vsyncpa [#allocation9], 0 }
   0x5   :  { %16 = vsyncpa [#allocation9 + $0x1], 0  ;;  %s1917_s12 = smov 0   ;;  %s1919_s13 = smov 0  }
   0x6   :  { %s1921_s14 = smov 0   ;;  %s1923_s15 = smov 0  }
   0x7 LB: > { %s1938_s16 = sadd.s32 4294967295, %s1886_s15   ;;  %s1608_s17 = sadd.s32 4294967294, %s1886_s15   ;;  %s1886_s15 = sphi %s1923_s15, %s2554_s15   ;;  %s1882_s14 = sphi %s1921_s14, %s2553_s14   ;;  %s1878_s13 = sphi %s1919_s13, %s2552_s13   ;;  %s1874_s12 = sphi %s1917_s12, %s2551_s12  }
   0x8   : > { %s1942_s18 = sadd.s32 1, %s1886_s15   ;;  %s71_s19 = sadd.s32 1, %s1882_s14 }
   0x9   : > { %s68_s20 = ssub.s32 %s1886_s15, %s1942_s18  ;;  %p81_p0 = scmp.ne.s32.totalorder %s1882_s14, %s1878_s13 }
   0xa   : > { %p69_p1 = scmp.eq.s32.totalorder %s68_s20, 0  ;;  %p82_p2 = scmp.eq.s32.totalorder %s1938_s16, 1 }
   0xb   : > { %p87_p3 = scmp.ne.s32.totalorder %s1878_s13, %s1874_s12  ;;  %p88_p4 = scmp.eq.s32.totalorder %s1608_s17, 1 }
   0xc   : > { %s1953_s21 = scalar_select %p69_p1, %s1882_s14, %s71_s19  }
   0xd   : > { %p1955_p5 = por %p82_p2, %p81_p0  ;;  %p1959_p6 = por %p88_p4, %p87_p3 }
   0xe   : > { %p1609_p7 = scmp.ge.s32.totalorder %s1886_s15, 1  ;;  %p121_p8 = scmp.lt.s32.totalorder %s1886_s15, 3 }
   0xf   : > { %p1678_p9 = scmp.eq.s32.totalorder %s1938_s16, 0  ;;  %s133_s27 = sshll.u32 %s2538_s0, 4  ;;  %s134_s27 = int_to_ptr.hbm [resolvable:$true] %s133_s27 }
  0x10   : > { %p1966_p10 = pnand %p1609_p7, %p121_p8  ;;  %s1888_s28 = smov [#allocation2]  }
  0x11   : > { %s135_s29 = sshll.u32 %s1888_s28, 4  ;;  %s145_s5 = sshll.u32 %s2539_s1, 4  ;;  %s136_s29 = int_to_ptr.vmem [resolvable:$true] %s135_s29  ;;  %s146_s5 = int_to_ptr.hbm [resolvable:$true] %s145_s5 }
  0x12   : > { %p1664_p11 = pneg %p1966_p10  ;;  %s1889_s6 = smov [#allocation5]  }
  0x13   : > { %s147_s7 = sshll.u32 %s1889_s6, 4  ;;  %160 = sbr.rel (%p1966_p10) target bundleno = 251 (0xfb), region = 28  ;;  %s148_s7 = int_to_ptr.vmem [resolvable:$true] %s147_s7 }
  0x14   : > { %p1665_p12 = pnand %p1678_p9, %p1664_p11 }
  0x16   : > { %1667 = dma.hbm_to_vmem [thread:$0]  (!%p1665_p12), %s134_s27, 64, %s136_s29, [#allocation3]  }
  0x17   : > { %1670 = dma.hbm_to_vmem [thread:$0]  (!%p1665_p12), %s146_s5, 64, %s148_s7, [#allocation6]  }
  0x18   : > { %1857 = dma.done.wait (%p1678_p9), [#allocation3], 64  }
  0x19   : > { %1859 = vsyncadd (%p1678_p9), [#allocation3], 4294967232 }
  0x1a   : > { %1861 = dma.done.wait (%p1678_p9), [#allocation6], 64  }
  0x1b   : > { %1863 = vsyncadd (%p1678_p9), [#allocation6], 4294967232  ;;  %s1617_s8 = sshll.u32 %s1938_s16, 3  ;;  %v191_v0 = vlaneseq  ;;  %v1991_v5 = vld [vmem:[#allocation5] sm:$0xf]  ;;  %s2286_s9 = sand.u32 1, %s1878_s13  }
  0x1c   : > { %v193_v1 = vstv %s1617_s8  ;;  %v1993_v6 = vld [vmem:[#allocation2] sm:$0xf]  ;;  %v199_v8 = vperm.slane %v1991_v5, 0  ;;  %v200_v10 = vperm.slane %v1991_v5, 1  ;;  %v201_v12 = vperm.slane %v1991_v5, 2  ;;  %s1615_s10 = sshll.u32 %s2286_s9, 5 }
  0x1d   : > { %v192_v2 = vshrl.u32 %v191_v0, 7  ;;  %v213_v9 = vperm.slane %v1993_v6, 0  ;;  %v214_v11 = vperm.slane %v1993_v6, 1  ;;  %v215_v13 = vperm.slane %v1993_v6, 2  ;;  %s2330_s11 = scalar_lea.vmem [#allocation7], %s1615_s10  ;;  %s2464_s17 = scalar_lea.vmem [#allocation8], %s1615_s10 }
  0x1e   : > { %v1890_v45 = vmov 683565275   ;;  %v1891_v47 = vmov 2475754826   ;;  %v1892_v49 = vmov 2131351028  }
  0x1f   : > { %v194_v3 = vadd.s32 %v193_v1, %v192_v2  ;;  %v1893_v51 = vmov 2102212464   ;;  %v1894_v53 = vmov 920167782   ;;  %v1895_v62 = vmov 1326507024  }
  0x20   : > { %s1650_s19 = sshll.u32 %s1938_s16, 5  ;;  %s1488_s29 = sshll.u32 %s2330_s11, 4  ;;  %s1489_s29 = int_to_ptr.vmem [resolvable:$true] %s1488_s29 }
  0x21   : > { %v195_v4 = vmul.u32 8, %v194_v3  ;;  %s1486_s25 = scalar_lea.hbm %s2540_s2, %s1650_s19  ;;  %s1501_s28 = scalar_lea.hbm %s2541_s3, %s1650_s19 }
  0x22   : > { %s1490_s16 = sshll.u32 %s1486_s25, 4  ;;  %s1503_s30 = sshll.u32 %s2464_s17, 4  ;;  %s1491_s16 = int_to_ptr.hbm [resolvable:$true] %s1490_s16  ;;  %s2490_s30 = int_to_ptr.vmem [resolvable:$true] %s1503_s30 }
  0x23   : > { %v1995_v7 = vcvt.s32.f32 %v195_v4  ;;  %s1505_s4 = sshll.u32 %s1501_s28, 4  ;;  %s1470_s5 = scalar_lea.sflag [#allocation4], %s2286_s9  ;;  %s2492_s4 = int_to_ptr.hbm [resolvable:$true] %s1505_s4 }
  0x24   : > { %s1798_s6 = sshra.s32 %s1491_s16, 4  ;;  %s1804_s19 = scalar_lea.hbm %s2540_s2, 64  ;;  %s1799_s6 = int_to_ptr.hbm [resolvable:$true] %s1798_s6 }
  0x25   : > { %v207_v14 = vadd.f32 %v199_v8, %v1995_v7  ;;  %v208_v15 = vadd.f32 %v200_v10, %v1995_v7  ;;  %v209_v16 = vadd.f32 %v201_v12, %v1995_v7  ;;  %s1800_s7 = scalar_lea.hbm %s1799_s6, 32  ;;  %p1805_p2 = scmp.lt.s32.totalorder %s1799_s6, %s2540_s2 }
  0x26   : > { %p1801_p13 = scmp.ne.s32.totalorder %s1799_s6, %s1800_s7  ;;  %p1806_p3 = scmp.lt.s32.totalorder %s1804_s19, %s1800_s7 }
  0x27   : > { %v2006_v17 = vmul.f32 %v213_v9, %v207_v14  ;;  %v2008_v18 = vmul.f32 %v214_v11, %v208_v15  ;;  %v2010_v19 = vmul.f32 %v215_v13, %v209_v16 }
  0x28   : > { %p1802_p0 = pnand %p1801_p13, %p1955_p5  ;;  %p1807_p4 = por %p1806_p3, %p1805_p2 }
  0x29   : > { %v225_v20 = vand.u32 2147483647, %v2006_v17  ;;  %v228_v21 = vand.u32 2139095040, %v2006_v17  ;;  %v379_v22 = vand.u32 2147483647, %v2008_v18  ;;  %v382_v23 = vand.u32 2139095040, %v2008_v18 }
  0x2a   : > { %v536_v24 = vand.u32 2139095040, %v2010_v19  ;;  %p1803_p1 = pneg %p1802_p0 }
  0x2b   : > { %v229_v25 = vshrl.u32 %v228_v21, 23  ;;  %v232_v26 = vand.u32 8388607, %v225_v20  ;;  %v383_v27 = vshrl.u32 %v382_v23, 23  ;;  %v386_v28 = vand.u32 8388607, %v379_v22 }
  0x2c   : > { %v537_v32 = vshrl.u32 %v536_v24, 23  ;;  %p1808_p7 = pnand %p1807_p4, %p1803_p1 }
  0x2d   : > { %v1618_v29 = vadd.s32 4294967169, %v229_v25  ;;  %v233_v30 = vor.u32 8388608, %v232_v26  ;;  %v1621_v31 = vadd.s32 4294967169, %v383_v27  ;;  %v387_v34 = vor.u32 8388608, %v386_v28 }
  0x2e   : > { %v1624_v38 = vadd.s32 4294967169, %v537_v32 }
  0x2f   : > { %v235_v33 = vadd.s32 1, %v1618_v29  ;;  %v389_v35 = vadd.s32 1, %v1621_v31  ;;  %v2021_v37 = vshll.u32 %v233_v30, 8  ;;  %v2027_v43 = vshll.u32 %v387_v34, 8 }
  0x30   : > { %v2035_v56 = vadd.s32 1, %v1624_v38 }
  0x31   : > { %vm236_vm0 = vcmp.gt.s32.totalorder %v235_v33, 0  ;;  %vm390_vm1 = vcmp.gt.s32.totalorder %v389_v35, 0  ;;  %v274_v55 = vand.u32 65535, %v2021_v37  ;;  %v275_v60 = vshrl.u32 %v2021_v37, 16 }
  0x32   : > { %v237_v36 = vsel %vm236_vm0, %v235_v33, 0  ;;  %v391_v40 = vsel %vm390_vm1, %v389_v35, 0  ;;  %vm544_vm15 = vcmp.gt.s32.totalorder %v2035_v56, 0 }
  0x33   : > { %v239_v39 = vand.u32 31, %v237_v36  ;;  %v2023_v41 = vshrl.u32 %v237_v36, 5  ;;  %v2025_v42 = vand.u32 31, %v391_v40  ;;  %v2055_v12 = vshrl.u32 %v391_v40, 5 }
  0x35   : > { %v240_v44 = vsub.s32 32, %v239_v39  ;;  %v242_v46 = vshll.u32 %v1890_v45, %v239_v39  ;;  %v245_v48 = vshll.u32 %v1891_v47, %v239_v39  ;;  %v248_v50 = vshll.u32 %v1892_v49, %v239_v39 }
  0x36   : > { %v251_v52 = vshll.u32 %v1893_v51, %v239_v39  ;;  %v254_v54 = vshll.u32 %v1894_v53, %v239_v39  ;;  %vm257_vm2 = vcmp.lt.s32.totalorder %v2023_v41, 1  ;;  %vm260_vm3 = vcmp.lt.s32.totalorder %v2023_v41, 4 }
  0x37   : > { %v243_v57 = vshrl.u32 %v1891_v47, %v240_v44  ;;  %v246_v58 = vshrl.u32 %v1892_v49, %v240_v44  ;;  %v249_v59 = vshrl.u32 %v1893_v51, %v240_v44  ;;  %v252_v61 = vshrl.u32 %v1894_v53, %v240_v44 }
  0x38   : > { %v255_v63 = vshrl.u32 %v1895_v62, %v240_v44  ;;  %v2046_v3 = vsub.s32 32, %v2025_v42  ;;  %v241_v4 = vshrl.u32 %v1890_v45, %v240_v44  ;;  %vm259_vm4 = vcmp.lt.s32.totalorder %v2023_v41, 3 }
  0x39   : > { %v244_v0 = vor.u32 %v243_v57, %v242_v46  ;;  %v247_v1 = vor.u32 %v246_v58, %v245_v48  ;;  %v250_v2 = vor.u32 %v249_v59, %v248_v50  ;;  %v253_v8 = vor.u32 %v252_v61, %v251_v52 }
  0x3a   : > { %v256_v9 = vor.u32 %v255_v63, %v254_v54  ;;  %vm258_vm5 = vcmp.lt.s32.totalorder %v2023_v41, 2  ;;  %v396_v15 = vshll.u32 %v1890_v45, %v2025_v42  ;;  %v399_v16 = vshll.u32 %v1891_v47, %v2025_v42 }
  0x3b   : > { %v265_v10 = vsel %vm257_vm2, %v244_v0, %v247_v1  ;;  %v269_v11 = vsel %vm257_vm2, %v247_v1, %v250_v2  ;;  %v266_v13 = vsel %vm260_vm3, %v253_v8, 920167782  ;;  %v262_v21 = vsel %vm260_vm3, %v250_v2, 2102212464 }
  0x3c   : > { %v270_v14 = vsel %vm260_vm3, %v256_v9, 1326507024  ;;  %v267_v23 = vsel %vm259_vm4, %v250_v2, %v266_v13  ;;  %v397_v25 = vshrl.u32 %v1891_v47, %v2046_v3  ;;  %v261_v26 = vsel %vm257_vm2, %v241_v4, %v244_v0 }
  0x3d   : > { %v271_v24 = vsel %vm259_vm4, %v253_v8, %v270_v14  ;;  %v268_v27 = vsel %vm258_vm5, %v265_v10, %v267_v23  ;;  %v400_v29 = vshrl.u32 %v1892_v49, %v2046_v3  ;;  %v263_v34 = vsel %vm259_vm4, %v247_v1, %v262_v21 }
  0x3e   : > { %v272_v28 = vsel %vm258_vm5, %v269_v11, %v271_v24  ;;  %v298_v32 = vand.u32 65535, %v268_v27  ;;  %v299_v33 = vshrl.u32 %v268_v27, 16  ;;  %v2083_v35 = vor.u32 %v397_v25, %v396_v15 }
  0x3f   : > { %v276_v30 = vand.u32 65535, %v272_v28  ;;  %v277_v31 = vshrl.u32 %v272_v28, 16  ;;  %v2085_v36 = vor.u32 %v400_v29, %v399_v16  ;;  %v402_v38 = vshll.u32 %v1892_v49, %v2025_v42 }
  0x40   : > { %v403_v46 = vshrl.u32 %v1893_v51, %v2046_v3  ;;  %v300_v50 = vmul.u32 %v298_v32, %v274_v55  ;;  %v301_v52 = vmul.u32 %v299_v33, %v274_v55  ;;  %v302_v54 = vmul.u32 %v298_v32, %v275_v60 }
  0x41   : > { %v278_v39 = vmul.u32 %v276_v30, %v274_v55  ;;  %v279_v40 = vmul.u32 %v277_v31, %v274_v55  ;;  %v280_v44 = vmul.u32 %v276_v30, %v275_v60  ;;  %v281_v48 = vmul.u32 %v277_v31, %v275_v60 }
  0x42   : > { %v303_v61 = vmul.u32 %v299_v33, %v275_v60  ;;  %v304_v0 = vshll.u32 %v301_v52, 16  ;;  %v305_v1 = vshrl.u32 %v301_v52, 16  ;;  %v306_v2 = vshll.u32 %v302_v54, 16 }
  0x43   : > { %v282_v57 = vshll.u32 %v279_v40, 16  ;;  %v283_v58 = vshrl.u32 %v279_v40, 16  ;;  %v284_v59 = vshll.u32 %v280_v44, 16  ;;  %v285_v63 = vshrl.u32 %v280_v44, 16 }
  0x44   : > { %v307_v8 = vshrl.u32 %v302_v54, 16  ;;  %v405_v9 = vshll.u32 %v1893_v51, %v2025_v42  ;;  %v1896_v10 = vmov 0   ;;  %vm308_vm7 = vc.u32 %v300_v50, %v304_v0 }
  0x45   : > { %vm286_vm6 = vc.u32 %v278_v39, %v282_v57  ;;  %v288_v4 = vadd.s32 %v282_v57, %v278_v39  ;;  %v310_v55 = vadd.s32 %v304_v0, %v300_v50  ;;  %v406_v13 = vshrl.u32 %v1894_v53, %v2046_v3 }
  0x46   : > { %v287_v11 = vsel %vm286_vm6, 1, %v1896_v10  ;;  %v309_v60 = vsel %vm308_vm7, 1, %v1896_v10  ;;  %v408_v15 = vshll.u32 %v1894_v53, %v2025_v42  ;;  %v404_v23 = vor.u32 %v403_v46, %v402_v38 }
  0x47   : > { %v289_v14 = vadd.s32 %v287_v11, %v281_v48  ;;  %vm290_vm8 = vc.u32 %v288_v4, %v284_v59  ;;  %v311_v21 = vadd.s32 %v309_v60, %v303_v61  ;;  %vm312_vm9 = vc.u32 %v310_v55, %v306_v2 }
  0x48   : > { %v291_v16 = vsel %vm290_vm8, 1, %v1896_v10  ;;  %v313_v25 = vsel %vm312_vm9, 1, %v1896_v10  ;;  %v407_v27 = vor.u32 %v406_v13, %v405_v9  ;;  %v409_v28 = vshrl.u32 %v1895_v62, %v2046_v3 }
  0x49   : > { %v293_v24 = vadd.s32 %v291_v16, %v289_v14  ;;  %v2103_v29 = vadd.s32 %v310_v55, %v306_v2  ;;  %v315_v30 = vadd.s32 %v313_v25, %v311_v21  ;;  %vm411_vm10 = vcmp.lt.s32.totalorder %v2055_v12, 1 }
  0x4a   : > { %vm413_vm11 = vcmp.lt.s32.totalorder %v2055_v12, 3  ;;  %v410_v31 = vor.u32 %v409_v28, %v408_v15  ;;  %vm412_vm12 = vcmp.lt.s32.totalorder %v2055_v12, 2  ;;  %vm414_vm13 = vcmp.lt.s32.totalorder %v2055_v12, 4 }
  0x4b   : > { %v294_v42 = vadd.s32 %v293_v24, %v283_v58  ;;  %v264_v32 = vsel %vm258_vm5, %v261_v26, %v263_v34  ;;  %v316_v33 = vadd.s32 %v315_v30, %v305_v1  ;;  %v419_v38 = vsel %vm411_vm10, %v2083_v35, %v2085_v36 }
  0x4c   : > { %v420_v39 = vsel %vm414_vm13, %v407_v27, 920167782  ;;  %v423_v46 = vsel %vm411_vm10, %v2085_v36, %v404_v23  ;;  %v428_v41 = vand.u32 65535, %v2027_v43  ;;  %v424_v48 = vsel %vm414_vm13, %v410_v31, 1326507024 }
  0x4d   : > { %v2117_v40 = vadd.s32 %v294_v42, %v285_v63  ;;  %v421_v44 = vsel %vm413_vm11, %v404_v23, %v420_v39  ;;  %v317_v26 = vadd.s32 %v316_v33, %v307_v8  ;;  %v429_v50 = vshrl.u32 %v2027_v43, 16 }
  0x4e   : > { %v422_v34 = vsel %vm412_vm12, %v419_v38, %v421_v44  ;;  %v318_v52 = vmul.u32 %v2021_v37, %v264_v32  ;;  %v425_v54 = vsel %vm413_vm11, %v407_v27, %v424_v48  ;;  %v395_v63 = vshrl.u32 %v1890_v45, %v2046_v3 }
  0x4f   : > { %vm320_vm14 = vc.u32 %v2117_v40, %v2103_v29  ;;  %v452_v57 = vand.u32 65535, %v422_v34  ;;  %v321_v58 = vadd.s32 1, %v317_v26  ;;  %v426_v59 = vsel %vm412_vm12, %v423_v46, %v425_v54 }
  0x50   : > { %v453_v61 = vshrl.u32 %v422_v34, 16  ;;  %v430_v0 = vand.u32 65535, %v426_v59  ;;  %v431_v1 = vshrl.u32 %v426_v59, 16  ;;  %v416_v2 = vsel %vm414_vm13, %v404_v23, 2102212464 }
  0x51   : > { %v322_v37 = vsel %vm320_vm14, %v321_v58, %v317_v26  ;;  %v456_v8 = vmul.u32 %v452_v57, %v429_v50  ;;  %v454_v13 = vmul.u32 %v452_v57, %v428_v41  ;;  %v545_v15 = vsel %vm544_vm15, %v2035_v56, 0 }
  0x52   : > { %v455_v4 = vmul.u32 %v453_v61, %v428_v41  ;;  %v323_v9 = vadd.s32 %v322_v37, %v318_v52  ;;  %v432_v11 = vmul.u32 %v430_v0, %v428_v41  ;;  %v433_v55 = vmul.u32 %v431_v1, %v428_v41 }
  0x53   : > { %v434_v14 = vmul.u32 %v430_v0, %v429_v50  ;;  %v415_v3 = vsel %vm411_vm10, %v395_v63, %v2083_v35  ;;  %v435_v21 = vmul.u32 %v431_v1, %v429_v50  ;;  %v417_v23 = vsel %vm413_vm11, %v2085_v36, %v416_v2 }
  0x54   : > { %v458_v60 = vshll.u32 %v455_v4, 16  ;;  %v324_v16 = vadd.s32 536870912, %v323_v9  ;;  %v436_v24 = vshll.u32 %v433_v55, 16  ;;  %v457_v27 = vmul.u32 %v453_v61, %v429_v50 }
  0x55   : > { %v438_v25 = vshll.u32 %v434_v14, 16  ;;  %v460_v28 = vshll.u32 %v456_v8, 16  ;;  %v547_v35 = vand.u32 31, %v545_v15  ;;  %v437_v38 = vshrl.u32 %v433_v55, 16 }
  0x56   : > { %v2149_v30 = vshrl.u32 %v324_v16, 30  ;;  %vm440_vm0 = vc.u32 %v432_v11, %v436_v24  ;;  %v442_v42 = vadd.s32 %v436_v24, %v432_v11  ;;  %vm462_vm1 = vc.u32 %v454_v13, %v458_v60 }
  0x57   : > { %v441_v56 = vsel %vm440_vm0, 1, %v1896_v10  ;;  %v463_v31 = vsel %vm462_vm1, 1, %v1896_v10  ;;  %v464_v32 = vadd.s32 %v458_v60, %v454_v13  ;;  %v459_v44 = vshrl.u32 %v455_v4, 16 }
  0x58   : > { %v326_v33 = vshll.u32 %v2149_v30, 30  ;;  %v443_v39 = vadd.s32 %v441_v56, %v435_v21  ;;  %vm444_vm2 = vc.u32 %v442_v42, %v438_v25  ;;  %v465_v46 = vadd.s32 %v463_v31, %v457_v27 }
  0x59   : > { %v445_v36 = vsel %vm444_vm2, 1, %v1896_v10  ;;  %vm466_vm3 = vc.u32 %v464_v32, %v460_v28  ;;  %v439_v26 = vshrl.u32 %v434_v14, 16  ;;  %v461_v50 = vshrl.u32 %v456_v8, 16 }
  0x5a   : > { %v327_v41 = vsub.s32 %v323_v9, %v326_v33  ;;  %v447_v34 = vadd.s32 %v445_v36, %v443_v39  ;;  %v467_v48 = vsel %vm466_vm3, 1, %v1896_v10  ;;  %v533_v54 = vand.u32 2147483647, %v2010_v19 }
  0x5b   : > { %v469_v52 = vadd.s32 %v467_v48, %v465_v46  ;;  %v2157_v57 = vsub.s32 32, %v547_v35  ;;  %v2159_v61 = vadd.s32 %v464_v32, %v460_v28  ;;  %v418_v63 = vsel %vm412_vm12, %v415_v3, %v417_v23 }
  0x5c   : > { %vm328_vm4 = vcmp.lt.s32.totalorder %v327_v41, 0  ;;  %v329_v58 = vsub.s32 0, %v327_v41  ;;  %v448_v59 = vadd.s32 %v447_v34, %v437_v38  ;;  %v550_v8 = vshll.u32 %v1890_v45, %v547_v35 }
  0x5d   : > { %v470_v0 = vadd.s32 %v469_v52, %v459_v44  ;;  %v551_v9 = vshrl.u32 %v1891_v47, %v2157_v57  ;;  %v472_v11 = vmul.u32 %v2027_v43, %v418_v63  ;;  %v540_v12 = vand.u32 8388607, %v533_v54 }
  0x5e   : > { %v330_v1 = vsel %vm328_vm4, %v329_v58, %v327_v41  ;;  %v2163_v37 = vadd.s32 %v448_v59, %v439_v26  ;;  %v2173_v55 = vshrl.u32 %v545_v15, 5  ;;  %v559_v60 = vshll.u32 %v1893_v51, %v547_v35 }
  0x5f   : > { %v331_v2 = vclz %v330_v1  ;;  %v471_v4 = vadd.s32 %v470_v0, %v461_v50  ;;  %v560_v16 = vshrl.u32 %v1894_v53, %v2157_v57  ;;  %v553_v3 = vshll.u32 %v1891_v47, %v547_v35 }
  0x60   : > { %vm474_vm5 = vc.u32 %v2163_v37, %v2159_v61  ;;  %v554_v43 = vshrl.u32 %v1892_v49, %v2157_v57  ;;  %v556_v21 = vshll.u32 %v1892_v49, %v547_v35  ;;  %v557_v24 = vshrl.u32 %v1893_v51, %v2157_v57 }
  0x61   : > { %v1619_v13 = vadd.s32 4294967294, %v331_v2  ;;  %v475_v14 = vadd.s32 1, %v471_v4  ;;  %v319_v15 = vadd.s32 %v2103_v29, %v2117_v40  ;;  %v2186_v25 = vor.u32 %v551_v9, %v550_v8 }
  0x62   : > { %v562_v42 = vshll.u32 %v1894_v53, %v547_v35  ;;  %v563_v56 = vshrl.u32 %v1895_v62, %v2157_v57  ;;  %v561_v38 = vor.u32 %v560_v16, %v559_v60  ;;  %v555_v36 = vor.u32 %v554_v43, %v553_v3 }
  0x63   : > { %vm1620_vm6 = vcmp.lt.s32.totalorder %v1619_v13, 0  ;;  %v476_v23 = vsel %vm474_vm5, %v475_v14, %v471_v4  ;;  %v558_v44 = vor.u32 %v557_v24, %v556_v21  ;;  %vm565_vm7 = vcmp.lt.s32.totalorder %v2173_v55, 1 }
  0x64   : > { %v334_v27 = vsel %vm1620_vm6, 0, %v1619_v13  ;;  %v477_v28 = vadd.s32 %v476_v23, %v472_v11  ;;  %vm567_vm8 = vcmp.lt.s32.totalorder %v2173_v55, 3  ;;  %vm568_vm9 = vcmp.lt.s32.totalorder %v2173_v55, 4 }
  0x65   : > { %v335_v31 = vsub.s32 32, %v334_v27  ;;  %v336_v32 = vshll.u32 %v327_v41, %v334_v27  ;;  %v339_v33 = vsub.s32 4294967266, %v334_v27  ;;  %v349_v35 = vsub.s32 4, %v2149_v30 }
  0x66   : > { %v478_v39 = vadd.s32 536870912, %v477_v28  ;;  %v541_v26 = vor.u32 8388608, %v540_v12  ;;  %v564_v34 = vor.u32 %v563_v56, %v562_v42  ;;  %vm227_vm10 = vcmp.lt.s32.totalorder %v2006_v17, 0 }
  0x67   : > { %v337_v29 = vshrl.u32 %v319_v15, %v335_v31  ;;  %v340_v40 = vadd.s32 127, %v339_v33  ;;  %v574_v50 = vsel %vm568_vm9, %v561_v38, 920167782  ;;  %vm566_vm11 = vcmp.lt.s32.totalorder %v2173_v55, 2 }
  0x68   : > { %v2195_v46 = vshrl.u32 %v478_v39, 30  ;;  %v573_v58 = vsel %vm565_vm7, %v2186_v25, %v555_v36  ;;  %v575_v59 = vsel %vm567_vm8, %v558_v44, %v574_v50  ;;  %vm2209_vm12 = vcmp.le.f32.partialorder %v225_v20, 0.7853982 }
  0x69   : > { %v338_v41 = vor.u32 %v337_v29, %v336_v32  ;;  %v341_v48 = vshll.u32 %v340_v40, 23  ;;  %v577_v2 = vsel %vm565_vm7, %v555_v36, %v558_v44  ;;  %v350_v4 = vsel %vm227_vm10, %v349_v35, %v2149_v30 }
  0x6a   : > { %v480_v52 = vshll.u32 %v2195_v46, 30  ;;  %v578_v9 = vsel %vm568_vm9, %v564_v34, 1326507024  ;;  %v2222_v11 = vshll.u32 %v541_v26, 8  ;;  %v549_v12 = vshrl.u32 %v1890_v45, %v2157_v57 }
  0x6b   : > { %v342_v0 = vor.u32 4788187, %v341_v48  ;;  %v345_v1 = vcvt.s32.f32 %v338_v41  ;;  %v576_v13 = vsel %vm566_vm11, %v573_v58, %v575_v59  ;;  %v579_v14 = vsel %vm567_vm8, %v561_v38, %v578_v9 }
  0x6c   : > { %v2218_v8 = vsub.s32 %v477_v28, %v480_v52  ;;  %v580_v60 = vsel %vm566_vm11, %v577_v2, %v579_v14  ;;  %v582_v16 = vand.u32 65535, %v2222_v11  ;;  %v583_v43 = vshrl.u32 %v2222_v11, 16 }
  0x6d   : > { %v343_v20 = vand.u32 2147483647, %v342_v0  ;;  %v584_v21 = vand.u32 65535, %v580_v60  ;;  %v585_v57 = vshrl.u32 %v580_v60, 16  ;;  %v2238_v24 = vsel %vm2209_vm12, 0, %v350_v4 }
  0x6e   : > { %vm482_vm13 = vcmp.lt.s32.totalorder %v2218_v8, 0  ;;  %v483_v30 = vsub.s32 0, %v2218_v8  ;;  %v570_v23 = vsel %vm568_vm9, %v558_v44, 2102212464  ;;  %v607_v27 = vshrl.u32 %v576_v13, 16 }
  0x6f   : > { %v346_v3 = vmul.f32 %v345_v1, %v343_v20  ;;  %v586_v56 = vmul.u32 %v584_v21, %v582_v16  ;;  %v587_v31 = vmul.u32 %v585_v57, %v582_v16  ;;  %v2244_v32 = vand.u32 3, %v2238_v24 }
  0x70   : > { %v484_v15 = vsel %vm482_vm13, %v483_v30, %v2218_v8  ;;  %v473_v33 = vadd.s32 %v2159_v61, %v2163_v37  ;;  %v2248_v38 = vmul.u32 %v584_v21, %v583_v43  ;;  %v569_v44 = vsel %vm565_vm7, %v549_v12, %v2186_v25 }
  0x71   : > { %v347_v28 = vxor.u32 2147483648, %v346_v3  ;;  %v485_v42 = vclz %v484_v15  ;;  %v590_v40 = vshll.u32 %v587_v31, 16  ;;  %v571_v26 = vsel %vm567_vm8, %v555_v36, %v570_v23 }
  0x72   : > { %v589_v61 = vmul.u32 %v585_v57, %v583_v43  ;;  %v606_v37 = vand.u32 65535, %v576_v13  ;;  %v2264_v41 = vmul.u32 %v607_v27, %v582_v16  ;;  %v592_v25 = vshll.u32 %v2248_v38, 16 }
  0x73   : > { %v348_v39 = vsel %vm227_vm10, %v347_v28, %v346_v3  ;;  %v1622_v29 = vadd.s32 4294967294, %v485_v42  ;;  %vm594_vm15 = vc.u32 %v586_v56, %v590_v40  ;;  %v596_v52 = vadd.s32 %v590_v40, %v586_v56 }
  0x74   : > { %v2258_v35 = vsel %vm2209_vm12, %v2006_v17, %v348_v39  ;;  %v595_v50 = vsel %vm594_vm15, 1, %v1896_v10  ;;  %v608_v2 = vmul.u32 %v606_v37, %v582_v16  ;;  %v610_v4 = vmul.u32 %v606_v37, %v583_v43 }
  0x75   : > { %v353_v34 = vmul.f32 %v2258_v35, %v2258_v35  ;;  %vm1623_vm14 = vcmp.lt.s32.totalorder %v1622_v29, 0  ;;  %v597_v1 = vadd.s32 %v595_v50, %v589_v61  ;;  %v591_v13 = vshrl.u32 %v587_v31, 16 }
  0x76   : > { %v488_v48 = vsel %vm1623_vm14, 0, %v1622_v29  ;;  %vm374_vm0 = vcmp.eq.s32.totalorder %v2244_v32, 2  ;;  %vm598_vm1 = vc.u32 %v596_v52, %v592_v25  ;;  %v611_v30 = vmul.u32 %v607_v27, %v583_v43 }
  0x77   : > { %v354_v58 = vmul.f32 -0.001358992, %v353_v34  ;;  %v361_v59 = vmul.f32 -0.00019511016, %v353_v34  ;;  %v489_v63 = vsub.s32 32, %v488_v48  ;;  %v490_v36 = vshll.u32 %v2218_v8, %v488_v48 }
  0x78   : > { %v493_v0 = vsub.s32 4294967266, %v488_v48  ;;  %v612_v60 = vshll.u32 %v2264_v41, 16  ;;  %vm381_vm2 = vcmp.lt.s32.totalorder %v2008_v18, 0  ;;  %v599_v57 = vsel %vm598_vm1, 1, %v1896_v10 }
  0x79   : > { %v355_v9 = vadd.f32 0.041655596, %v354_v58  ;;  %v362_v20 = vadd.f32 0.008332121, %v361_v59  ;;  %v491_v12 = vshrl.u32 %v473_v33, %v489_v63  ;;  %vm2275_vm3 = vcmp.le.f32.partialorder %v379_v22, 0.7853982 }
  0x7a   : > { %v494_v14 = vadd.s32 127, %v493_v0  ;;  %v593_v23 = vshrl.u32 %v2248_v38, 16  ;;  %v601_v28 = vadd.s32 %v599_v57, %v597_v1  ;;  %v614_v43 = vshll.u32 %v610_v4, 16 }
  0x7b   : > { %v356_v3 = vmul.f32 %v355_v9, %v353_v34  ;;  %v363_v21 = vmul.f32 %v362_v20, %v353_v34  ;;  %v492_v8 = vor.u32 %v491_v12, %v490_v36  ;;  %vm616_vm4 = vc.u32 %v608_v2, %v612_v60 }
  0x7c   : > { %v495_v15 = vshll.u32 %v494_v14, 23  ;;  %v602_v33 = vadd.s32 %v601_v28, %v591_v13  ;;  %v617_v39 = vsel %vm616_vm4, 1, %v1896_v10  ;;  %v618_v29 = vadd.s32 %v612_v60, %v608_v2 }
  0x7d   : > { %v357_v27 = vadd.f32 -0.4999988, %v356_v3  ;;  %v364_v42 = vadd.f32 -0.16666654, %v363_v21  ;;  %v499_v56 = vcvt.s32.f32 %v492_v8  ;;  %v619_v61 = vadd.s32 %v617_v39, %v611_v30 }
  0x7e   : > { %v496_v31 = vor.u32 4788187, %v495_v15  ;;  %v202_v37 = vperm.slane %v1991_v5, 3  ;;  %v572_v38 = vsel %vm566_vm11, %v569_v44, %v571_v26  ;;  %v613_v25 = vshrl.u32 %v2264_v41, 16 }
  0x7f   : > { %v358_v40 = vmul.f32 %v357_v27, %v353_v34  ;;  %v365_v22 = vmul.f32 %v364_v42, %v353_v34  ;;  %vm620_vm5 = vc.u32 %v618_v29, %v614_v43  ;;  %v2292_v63 = vadd.s32 %v602_v33, %v593_v23 }
  0x80   : > { %v497_v48 = vand.u32 2147483647, %v496_v31  ;;  %v621_v58 = vsel %vm620_vm5, 1, %v1896_v10  ;;  %v210_v34 = vadd.f32 %v202_v37, %v1995_v7  ;;  %v615_v5 = vshrl.u32 %v610_v4, 16 }
  0x81   : > { %v2288_v50 = vadd.f32 1.0, %v358_v40  ;;  %v366_v52 = vadd.f32 1.0, %v365_v22  ;;  %v623_v36 = vadd.s32 %v621_v58, %v619_v61  ;;  %v2298_v26 = vadd.s32 %v618_v29, %v614_v43 }
  0x82   : > { %v500_v59 = vmul.f32 %v499_v56, %v497_v48  ;;  %v216_v41 = vperm.slane %v1993_v6, 3  ;;  %vm368_vm6 = vweird.f32 %v2006_v17  ;;  %vm371_vm7 = vcmp.eq.s32.totalorder %v2244_v32, 0 }
  0x83   : > { %v2295_v55 = vmul.f32 %v366_v52, %v2258_v35  ;;  %v375_v44 = vxor.u32 2147483648, %v2288_v50  ;;  %v624_v0 = vadd.s32 %v623_v36, %v613_v25  ;;  %vm370_vm8 = vcmp.lt.s32.totalorder %v2244_v32, 2 }
  0x84   : > { %v501_v7 = vxor.u32 2147483648, %v500_v59  ;;  %v2311_v2 = vmul.f32 %v216_v41, %v210_v34  ;;  %v503_v4 = vsub.s32 4, %v2195_v46  ;;  %v626_v20 = vmul.u32 %v2222_v11, %v572_v38 }
  0x85   : > { %v372_v1 = vxor.u32 2147483648, %v2295_v55  ;;  %v376_v35 = vsel %vm374_vm0, %v375_v44, %v2295_v55  ;;  %v625_v9 = vadd.s32 %v624_v0, %v615_v5  ;;  %vm628_vm9 = vc.u32 %v2292_v63, %v2298_v26 }
  0x86   : > { %v502_v6 = vsel %vm381_vm2, %v501_v7, %v500_v59  ;;  %v690_v13 = vand.u32 2139095040, %v2311_v2  ;;  %v504_v15 = vsel %vm381_vm2, %v503_v4, %v2195_v46  ;;  %v687_v28 = vand.u32 2147483647, %v2311_v2 }
  0x87   : > { %v373_v12 = vsel %vm371_vm7, %v2288_v50, %v372_v1  ;;  %v505_v32 = vsel %vm2275_vm3, %v2008_v18, %v502_v6  ;;  %v629_v60 = vadd.s32 1, %v625_v9  ;;  %v2339_v33 = vsel %vm2275_vm3, 0, %v504_v15 }
  0x88   : > { %v377_v14 = vsel %vm370_vm8, %v373_v12, %v376_v35  ;;  %v507_v30 = vmul.f32 %v505_v32, %v505_v32  ;;  %v691_v11 = vshrl.u32 %v690_v13, 23  ;;  %v523_v40 = vand.u32 3, %v2339_v33 }
  0x89   : > { %v378_v3 = vsel %vm368_vm6, nan, %v377_v14  ;;  %v630_v57 = vsel %vm628_vm9, %v629_v60, %v625_v9  ;;  %v694_v46 = vand.u32 8388607, %v687_v28  ;;  %vm522_vm11 = vweird.f32 %v2008_v18 }
  0x8a   : > { %841 = vst [vmem:[%s2330_s11] sm:$0xff] %v378_v3  ;;  %v508_v21 = vmul.f32 -0.001358992, %v507_v30  ;;  %v515_v8 = vmul.f32 -0.00019511016, %v507_v30  ;;  %v631_v23 = vadd.s32 %v630_v57, %v626_v20  ;;  %v1627_v43 = vadd.s32 4294967169, %v691_v11 }
  0x8b   : > { %vm524_vm12 = vcmp.lt.s32.totalorder %v523_v40, 2  ;;  %vm525_vm13 = vcmp.eq.s32.totalorder %v523_v40, 0  ;;  %vm528_vm14 = vcmp.eq.s32.totalorder %v523_v40, 2  ;;  %v695_v36 = vor.u32 8388608, %v694_v46 }
  0x8c   : > { %v509_v27 = vadd.f32 0.041655596, %v508_v21  ;;  %v516_v42 = vadd.f32 0.008332121, %v515_v8  ;;  %v632_v56 = vadd.s32 536870912, %v631_v23  ;;  %v697_v31 = vadd.s32 1, %v1627_v43 }
  0x8d   : > { %vm2401_vm5 = vcmp.le.f32.partialorder %v533_v54, 0.7853982  ;;  %vm535_vm7 = vcmp.lt.s32.totalorder %v2010_v19, 0 }
  0x8e   : > { %v510_v39 = vmul.f32 %v509_v27, %v507_v30  ;;  %v517_v29 = vmul.f32 %v516_v42, %v507_v30  ;;  %v2342_v22 = vshrl.u32 %v632_v56, 30  ;;  %vm698_vm10 = vcmp.gt.s32.totalorder %v697_v31, 0 }
  0x8f   : > { %v699_v48 = vsel %vm698_vm10, %v697_v31, 0 }
  0x90   : > { %v511_v61 = vadd.f32 -0.4999988, %v510_v39  ;;  %v518_v37 = vadd.f32 -0.16666654, %v517_v29  ;;  %v634_v38 = vshll.u32 %v2342_v22, 30  ;;  %v701_v25 = vand.u32 31, %v699_v48 }
  0x91   : > { %v2357_v12 = vshrl.u32 %v699_v48, 5 }
  0x92   : > { %v512_v52 = vmul.f32 %v511_v61, %v507_v30  ;;  %v519_v16 = vmul.f32 %v518_v37, %v507_v30  ;;  %v635_v58 = vsub.s32 %v631_v23, %v634_v38  ;;  %v702_v34 = vsub.s32 32, %v701_v25 }
  0x93   : > { %v704_v7 = vshll.u32 %v1890_v45, %v701_v25  ;;  %v707_v0 = vshll.u32 %v1891_v47, %v701_v25  ;;  %v710_v13 = vshll.u32 %v1892_v49, %v701_v25  ;;  %v713_v14 = vshll.u32 %v1893_v51, %v701_v25 }
  0x94   : > { %v2348_v59 = vadd.f32 1.0, %v512_v52  ;;  %v520_v5 = vadd.f32 1.0, %v519_v16  ;;  %vm636_vm15 = vcmp.lt.s32.totalorder %v635_v58, 0  ;;  %v637_v41 = vsub.s32 0, %v635_v58 }
  0x95   : > { %v705_v4 = vshrl.u32 %v1891_v47, %v702_v34  ;;  %v708_v9 = vshrl.u32 %v1892_v49, %v702_v34  ;;  %v711_v3 = vshrl.u32 %v1893_v51, %v702_v34  ;;  %v627_v47 = vadd.s32 %v2298_v26, %v2292_v63 }
  0x96   : > { %v2352_v35 = vmul.f32 %v520_v5, %v505_v32  ;;  %v529_v6 = vxor.u32 2147483648, %v2348_v59  ;;  %v638_v20 = vsel %vm636_vm15, %v637_v41, %v635_v58  ;;  %v714_v11 = vshrl.u32 %v1894_v53, %v702_v34 }
  0x97   : > { %v639_v60 = vclz %v638_v20  ;;  %v716_v21 = vshll.u32 %v1894_v53, %v701_v25  ;;  %v717_v49 = vshrl.u32 %v1895_v62, %v702_v34  ;;  %v706_v15 = vor.u32 %v705_v4, %v704_v7 }
  0x98   : > { %v526_v30 = vxor.u32 2147483648, %v2352_v35  ;;  %v530_v32 = vsel %vm528_vm14, %v529_v6, %v2352_v35  ;;  %v709_v23 = vor.u32 %v708_v9, %v707_v0  ;;  %v715_v43 = vor.u32 %v714_v11, %v713_v14 }
  0x99   : > { %v1625_v57 = vadd.s32 4294967294, %v639_v60  ;;  %vm719_vm0 = vcmp.lt.s32.totalorder %v2357_v12, 1  ;;  %v2377_v63 = vshll.u32 %v695_v36, 8  ;;  %v712_v62 = vor.u32 %v711_v3, %v710_v13 }
  0x9a   : > { %v527_v8 = vsel %vm525_vm13, %v2348_v59, %v526_v30  ;;  %vm720_vm2 = vcmp.lt.s32.totalorder %v2357_v12, 2  ;;  %v718_v27 = vor.u32 %v717_v49, %v716_v21  ;;  %vm721_vm3 = vcmp.lt.s32.totalorder %v2357_v12, 3 }
  0x9b   : > { %v531_v51 = vsel %vm524_vm12, %v527_v8, %v530_v32  ;;  %vm1626_vm1 = vcmp.lt.s32.totalorder %v1625_v57, 0  ;;  %vm722_vm4 = vcmp.lt.s32.totalorder %v2357_v12, 4  ;;  %v727_v39 = vsel %vm719_vm0, %v706_v15, %v709_v23 }
  0x9c   : > { %v532_v53 = vsel %vm522_vm11, nan, %v531_v51  ;;  %v642_v26 = vsel %vm1626_vm1, 0, %v1625_v57  ;;  %v728_v29 = vsel %vm722_vm4, %v715_v43, 920167782  ;;  %v736_v37 = vand.u32 65535, %v2377_v63 }
  0x9d   : > { %842 = vst [vmem:[%s2330_s11 + $0x8] sm:$0xff] %v532_v53  ;;  %v643_v42 = vsub.s32 32, %v642_v26  ;;  %v644_v56 = vshll.u32 %v635_v58, %v642_v26  ;;  %v647_v31 = vsub.s32 4294967266, %v642_v26  ;;  %v729_v61 = vsel %vm721_vm3, %v712_v62, %v728_v29 }
  0x9e   : > { %v730_v48 = vsel %vm720_vm2, %v727_v39, %v729_v61  ;;  %v731_v38 = vsel %vm719_vm0, %v709_v23, %v712_v62  ;;  %v732_v25 = vsel %vm722_vm4, %v718_v27, 1326507024  ;;  %v737_v52 = vshrl.u32 %v2377_v63, 16 }
  0x9f   : > { %v645_v40 = vshrl.u32 %v627_v47, %v643_v42  ;;  %v648_v46 = vadd.s32 127, %v647_v31  ;;  %v733_v36 = vsel %vm721_vm3, %v715_v43, %v732_v25  ;;  %v760_v41 = vand.u32 65535, %v730_v48 }
  0xa0   : > { %v703_v7 = vshrl.u32 %v1890_v45, %v702_v34  ;;  %v734_v0 = vsel %vm720_vm2, %v731_v38, %v733_v36  ;;  %v761_v4 = vshrl.u32 %v730_v48, 16  ;;  %v724_v14 = vsel %vm722_vm4, %v712_v62, 2102212464 }
  0xa1   : > { %v646_v58 = vor.u32 %v645_v40, %v644_v56  ;;  %v649_v5 = vshll.u32 %v648_v46, 23  ;;  %v738_v54 = vand.u32 65535, %v734_v0  ;;  %v739_v13 = vshrl.u32 %v734_v0, 16 }
  0xa2   : > { %v762_v32 = vmul.u32 %v760_v41, %v736_v37  ;;  %v763_v60 = vmul.u32 %v761_v4, %v736_v37  ;;  %v764_v3 = vmul.u32 %v760_v41, %v737_v52  ;;  %v723_v45 = vsel %vm719_vm0, %v703_v7, %v706_v15 }
  0xa3   : > { %v650_v9 = vor.u32 4788187, %v649_v5  ;;  %v653_v20 = vcvt.s32.f32 %v646_v58  ;;  %v740_v11 = vmul.u32 %v738_v54, %v736_v37  ;;  %v741_v21 = vmul.u32 %v739_v13, %v736_v37 }
  0xa4   : > { %v742_v49 = vmul.u32 %v738_v54, %v737_v52  ;;  %v765_v34 = vmul.u32 %v761_v4, %v737_v52  ;;  %v766_v8 = vshll.u32 %v763_v60, 16  ;;  %v768_v57 = vshll.u32 %v764_v3, 16 }
  0xa5   : > { %v651_v47 = vand.u32 2147483647, %v650_v9  ;;  %v743_v43 = vmul.u32 %v739_v13, %v737_v52  ;;  %v744_v53 = vshll.u32 %v741_v21, 16  ;;  %v725_v62 = vsel %vm721_vm3, %v709_v23, %v724_v14 }
  0xa6   : > { %v746_v26 = vshll.u32 %v742_v49, 16  ;;  %v767_v27 = vshrl.u32 %v763_v60, 16  ;;  %vm770_vm8 = vc.u32 %v762_v32, %v766_v8  ;;  %v772_v42 = vadd.s32 %v766_v8, %v762_v32 }
  0xa7   : > { %v654_v51 = vmul.f32 %v653_v20, %v651_v47  ;;  %vm748_vm9 = vc.u32 %v740_v11, %v744_v53  ;;  %v750_v31 = vadd.s32 %v744_v53, %v740_v11  ;;  %v771_v39 = vsel %vm770_vm8, 1, %v1896_v10 }
  0xa8   : > { %v745_v29 = vshrl.u32 %v741_v21, 16  ;;  %v749_v15 = vsel %vm748_vm9, 1, %v1896_v10  ;;  %v773_v40 = vadd.s32 %v771_v39, %v765_v34  ;;  %vm774_vm10 = vc.u32 %v772_v42, %v768_v57 }
  0xa9   : > { %v655_v56 = vxor.u32 2147483648, %v654_v51  ;;  %v751_v61 = vadd.s32 %v749_v15, %v743_v43  ;;  %vm752_vm12 = vc.u32 %v750_v31, %v746_v26  ;;  %v775_v23 = vsel %vm774_vm10, 1, %v1896_v10 }
  0xaa   : > { %v753_v48 = vsel %vm752_vm12, 1, %v1896_v10  ;;  %v769_v38 = vshrl.u32 %v764_v3, 16  ;;  %v777_v25 = vadd.s32 %v775_v23, %v773_v40  ;;  %v747_v58 = vshrl.u32 %v742_v49, 16 }
  0xab   : > { %v656_v46 = vsel %vm535_vm7, %v655_v56, %v654_v51  ;;  %v755_v5 = vadd.s32 %v753_v48, %v751_v61  ;;  %v657_v36 = vsub.s32 4, %v2342_v22  ;;  %v726_v41 = vsel %vm720_vm2, %v723_v45, %v725_v62 }
  0xac   : > { %v659_v37 = vsel %vm2401_vm5, %v2010_v19, %v656_v46  ;;  %v778_v7 = vadd.s32 %v777_v25, %v767_v27  ;;  %v776_v20 = vadd.s32 %v772_v42, %v768_v57  ;;  %v780_v10 = vmul.u32 %v2377_v63, %v726_v41 }
  0xad   : > { %v661_v52 = vmul.f32 %v659_v37, %v659_v37  ;;  %v756_v9 = vadd.s32 %v755_v5, %v745_v29  ;;  %v658_v60 = vsel %vm535_vm7, %v657_v36, %v2342_v22  ;;  %vm676_vm1 = vweird.f32 %v2010_v19 }
  0xae   : > { %v779_v54 = vadd.s32 %v778_v7, %v769_v38  ;;  %v660_v21 = vsel %vm2401_vm5, 0, %v658_v60  ;;  %v989_v23 = vadd.s32 3, %v2238_v24 }
  0xaf   : > { %v662_v0 = vmul.f32 -0.001358992, %v661_v52  ;;  %v669_v4 = vmul.f32 -0.00019511016, %v661_v52  ;;  %v757_v32 = vadd.s32 %v756_v9, %v747_v58  ;;  %v677_v8 = vand.u32 3, %v660_v21 }
  0xb0   : > { %v783_v3 = vadd.s32 1, %v779_v54  ;;  %v1299_v48 = vadd.s32 3, %v660_v21 }
  0xb1   : > { %v663_v13 = vadd.f32 0.041655596, %v662_v0  ;;  %v670_v14 = vadd.f32 0.008332121, %v669_v4  ;;  %vm782_vm13 = vc.u32 %v757_v32, %v776_v20  ;;  %vm682_vm14 = vcmp.eq.s32.totalorder %v677_v8, 2 }
  0xb2   : > { %v784_v12 = vsel %vm782_vm13, %v783_v3, %v779_v54  ;;  %vm679_vm15 = vcmp.eq.s32.totalorder %v677_v8, 0  ;;  %vm678_vm0 = vcmp.lt.s32.totalorder %v677_v8, 2  ;;  %v781_v38 = vadd.s32 %v776_v20, %v757_v32 }
  0xb3   : > { %v664_v47 = vmul.f32 %v663_v13, %v661_v52  ;;  %v671_v11 = vmul.f32 %v670_v14, %v661_v52  ;;  %v785_v34 = vadd.s32 %v784_v12, %v780_v10  ;;  %v1300_v7 = vand.u32 3, %v1299_v48 }
  0xb5   : > { %v665_v49 = vadd.f32 -0.4999988, %v664_v47  ;;  %v672_v45 = vadd.f32 -0.16666654, %v671_v11  ;;  %v786_v43 = vadd.s32 536870912, %v785_v34  ;;  %vm1301_vm12 = vcmp.lt.s32.totalorder %v1300_v7, 2 }
  0xb6   : > { %vm1302_vm13 = vcmp.eq.s32.totalorder %v1300_v7, 0 }
  0xb7   : > { %v666_v57 = vmul.f32 %v665_v49, %v661_v52  ;;  %v673_v51 = vmul.f32 %v672_v45, %v661_v52  ;;  %v2437_v26 = vshrl.u32 %v786_v43, 30  ;;  %v990_v52 = vand.u32 3, %v989_v23 }
  0xb9   : > { %v2435_v63 = vadd.f32 1.0, %v666_v57  ;;  %v674_v53 = vadd.f32 1.0, %v673_v51  ;;  %v788_v16 = vshll.u32 %v2437_v26, 30  ;;  %vm992_vm4 = vcmp.eq.s32.totalorder %v990_v52, 0 }
  0xba   : > { %vm995_vm5 = vcmp.eq.s32.totalorder %v990_v52, 2  ;;  %vm991_vm7 = vcmp.lt.s32.totalorder %v990_v52, 2  ;;  %v994_v24 = vsel %vm992_vm4, %v2288_v50, %v372_v1  ;;  %v811_v60 = vsub.s32 4, %v2437_v26 }
  0xbb   : > { %v675_v22 = vmul.f32 %v674_v53, %v659_v37  ;;  %v683_v62 = vxor.u32 2147483648, %v2435_v63  ;;  %v789_v56 = vsub.s32 %v785_v34, %v788_v16  ;;  %v1144_v37 = vadd.s32 3, %v2339_v33 }
  0xbc   : > { %v997_v33 = vsel %vm995_vm5, %v375_v44, %v2295_v55  ;;  %vm830_vm5 = vweird.f32 %v2311_v2 }
  0xbd   : > { %v680_v27 = vxor.u32 2147483648, %v675_v22  ;;  %v684_v42 = vsel %vm682_vm14, %v683_v62, %v675_v22  ;;  %vm790_vm2 = vcmp.lt.s32.totalorder %v789_v56, 0  ;;  %v791_v39 = vsub.s32 0, %v789_v56 }
  0xbe   : > { %v1145_v58 = vand.u32 3, %v1144_v37  ;;  %v998_v54 = vsel %vm991_vm7, %v994_v24, %v997_v33  ;;  %vm689_vm14 = vcmp.lt.s32.totalorder %v2311_v2, 0 }
  0xbf   : > { %v681_v31 = vsel %vm679_vm15, %v2435_v63, %v680_v27  ;;  %v792_v40 = vsel %vm790_vm2, %v791_v39, %v789_v56  ;;  %v999_v14 = vsel %vm368_vm6, nan, %v998_v54  ;;  %vm1305_vm6 = vcmp.eq.s32.totalorder %v1300_v7, 2 }
  0xc0   : > { %v685_v29 = vsel %vm678_vm0, %v681_v31, %v684_v42  ;;  %v793_v46 = vclz %v792_v40  ;;  %vm1146_vm8 = vcmp.lt.s32.totalorder %v1145_v58, 2  ;;  %vm1147_vm9 = vcmp.eq.s32.totalorder %v1145_v58, 0  ;;  %1465 = vst [vmem:[%s2464_s17] sm:$0xff] %v999_v14 }
  0xc1   : > { %v686_v15 = vsel %vm676_vm1, nan, %v685_v29  ;;  %vm1150_vm10 = vcmp.eq.s32.totalorder %v1145_v58, 2  ;;  %v1149_v13 = vsel %vm1147_vm9, %v2348_v59, %v526_v30  ;;  %v1304_v30 = vsel %vm1302_vm13, %v2435_v63, %v680_v27 }
  0xc2   : > { %843 = vst [vmem:[%s2330_s11 + $0x10] sm:$0xff] %v686_v15  ;;  %v1628_v61 = vadd.s32 4294967294, %v793_v46  ;;  %v1152_v1 = vsel %vm1150_vm10, %v529_v6, %v2352_v35  ;;  %v1307_v35 = vsel %vm1305_vm6, %v683_v62, %v675_v22  ;;  %vm688_vm15 = vcmp.le.f32.partialorder %v687_v28, 0.7853982 }
  0xc3   : > { %v1153_v44 = vsel %vm1146_vm8, %v1149_v13, %v1152_v1  ;;  %v1308_v6 = vsel %vm1301_vm12, %v1304_v30, %v1307_v35  ;;  %v812_v47 = vsel %vm689_vm14, %v811_v60, %v2437_v26 }
  0xc4   : > { %vm1629_vm3 = vcmp.lt.s32.totalorder %v1628_v61, 0  ;;  %v1154_v17 = vsel %vm522_vm11, nan, %v1153_v44  ;;  %v1309_v10 = vsel %vm676_vm1, nan, %v1308_v6  ;;  %v814_v21 = vsel %vm688_vm15, 0, %v812_v47 }
  0xc5   : > { %v796_v25 = vsel %vm1629_vm3, 0, %v1628_v61  ;;  %1466 = vst [vmem:[%s2464_s17 + $0x8] sm:$0xff] %v1154_v17  ;;  %v1454_v8 = vadd.s32 3, %v814_v21  ;;  %v831_v53 = vand.u32 3, %v814_v21 }
  0xc6   : > { %v797_v5 = vsub.s32 32, %v796_v25  ;;  %v798_v36 = vshll.u32 %v789_v56, %v796_v25  ;;  %v801_v41 = vsub.s32 4294967266, %v796_v25  ;;  %1467 = vst [vmem:[%s2464_s17 + $0x10] sm:$0xff] %v1309_v10 }
  0xc7   : > { %v1455_v28 = vand.u32 3, %v1454_v8  ;;  %vm836_vm11 = vcmp.eq.s32.totalorder %v831_v53, 2  ;;  %vm832_vm1 = vcmp.lt.s32.totalorder %v831_v53, 2  ;;  %vm833_vm2 = vcmp.eq.s32.totalorder %v831_v53, 0 }
  0xc8   : > { %v799_v0 = vshrl.u32 %v781_v38, %v797_v5  ;;  %v802_v4 = vadd.s32 127, %v801_v41 }
  0xc9   : > { %vm1460_vm0 = vcmp.eq.s32.totalorder %v1455_v28, 2  ;;  %vm1457_vm3 = vcmp.eq.s32.totalorder %v1455_v28, 0  ;;  %vm1456_vm4 = vcmp.lt.s32.totalorder %v1455_v28, 2 }
  0xca   : > { %v800_v9 = vor.u32 %v799_v0, %v798_v36  ;;  %v803_v20 = vshll.u32 %v802_v4, 23 }
  0xcc   : > { %v804_v50 = vor.u32 4788187, %v803_v20  ;;  %v807_v55 = vcvt.s32.f32 %v800_v9 }
  0xce   : > { %v805_v59 = vand.u32 2147483647, %v804_v50 }
  0xd0   : > { %v808_v32 = vmul.f32 %v807_v55, %v805_v59 }
  0xd2   : > { %v809_v3 = vxor.u32 2147483648, %v808_v32 }
  0xd4   : > { %v810_v18 = vsel %vm689_vm14, %v809_v3, %v808_v32 }
  0xd5   : > { %v813_v11 = vsel %vm688_vm15, %v2311_v2, %v810_v18 }
  0xd6   : > { %v815_v12 = vmul.f32 %v813_v11, %v813_v11 }
  0xd8   : > { %v816_v49 = vmul.f32 -0.001358992, %v815_v12  ;;  %v823_v19 = vmul.f32 -0.00019511016, %v815_v12 }
  0xda   : > { %v817_v45 = vadd.f32 0.041655596, %v816_v49  ;;  %v824_v34 = vadd.f32 0.008332121, %v823_v19 }
  0xdc   : > { %v818_v57 = vmul.f32 %v817_v45, %v815_v12  ;;  %v825_v51 = vmul.f32 %v824_v34, %v815_v12 }
  0xde   : > { %v819_v43 = vadd.f32 -0.4999988, %v818_v57  ;;  %v826_v63 = vadd.f32 -0.16666654, %v825_v51 }
  0xe0   : > { %v820_v22 = vmul.f32 %v819_v43, %v815_v12  ;;  %v827_v62 = vmul.f32 %v826_v63, %v815_v12 }
  0xe2   : > { %v821_v26 = vadd.f32 1.0, %v820_v22  ;;  %v828_v16 = vadd.f32 1.0, %v827_v62 }
  0xe4   : > { %v829_v27 = vmul.f32 %v828_v16, %v813_v11  ;;  %v837_v42 = vxor.u32 2147483648, %v821_v26 }
  0xe6   : > { %v834_v56 = vxor.u32 2147483648, %v829_v27  ;;  %v838_v31 = vsel %vm836_vm11, %v837_v42, %v829_v27  ;;  %v1462_v39 = vsel %vm1460_vm0, %v837_v42, %v829_v27 }
  0xe8   : > { %v835_v29 = vsel %vm833_vm2, %v821_v26, %v834_v56  ;;  %v1459_v15 = vsel %vm1457_vm3, %v821_v26, %v834_v56 }
  0xe9   : > { %v839_v40 = vsel %vm832_vm1, %v835_v29, %v838_v31  ;;  %v1463_v46 = vsel %vm1456_vm4, %v1459_v15, %v1462_v39 }
  0xea   : > { %v840_v61 = vsel %vm830_vm5, nan, %v839_v40  ;;  %v1464_v23 = vsel %vm830_vm5, nan, %v1463_v46 }
  0xeb   : > { %844 = vst [vmem:[%s2330_s11 + $0x18] sm:$0xff] %v840_v61 }
  0xec   : > { %1468 = vst [vmem:[%s2464_s17 + $0x18] sm:$0xff] %v1464_v23 }
  0xed   : > { %1811 = shalt.err (!%p1808_p7)
}
  0xee   : > { %1660 = dma.vmem_to_hbm [thread:$0]  (%p1955_p5), %s1489_s29, 512, %s1491_s16, %s1470_s5  }
  0xef   : > { %s1475_s11 = scalar_lea.sflag [#allocation9], %s2286_s9  ;;  %s1826_s17 = sshra.s32 %s2492_s4, 4  ;;  %s1827_s17 = int_to_ptr.hbm [resolvable:$true] %s1826_s17 }
  0xf0   : > { %s1828_s25 = scalar_lea.hbm %s1827_s17, 32  ;;  %s1832_s28 = scalar_lea.hbm %s2541_s3, 64 }
  0xf1   : > { %p1829_p8 = scmp.ne.s32.totalorder %s1827_s17, %s1828_s25  ;;  %p1833_p11 = scmp.lt.s32.totalorder %s1827_s17, %s2541_s3 }
  0xf2   : > { %p1834_p12 = scmp.lt.s32.totalorder %s1832_s28, %s1828_s25 }
  0xf3   : > { %p1830_p9 = pnand %p1829_p8, %p1955_p5 }
  0xf4   : > { %p1835_p13 = por %p1834_p12, %p1833_p11 }
  0xf5   : > { %p1831_p10 = pneg %p1830_p9 }
  0xf7   : > { %p1836_p0 = pnand %p1835_p13, %p1831_p10 }
  0xf9   : > { %1839 = shalt.err (!%p1836_p0)
}
  0xfa   : > { %1661 = dma.vmem_to_hbm [thread:$0]  (%p1955_p5), %s2490_s30, 512, %s2492_s4, %s1475_s11  }
  0xfb PF: > { %p1682_p1 = scmp.ge.s32.totalorder %s1886_s15, 2  ;;  %s1517_s9 = sand.u32 1, %s1874_s12  }
  0xfc   : > { %s1518_s29 = scalar_lea.sflag [#allocation4], %s1517_s9 }
  0xfd   : > { %p1672_p2 = pnand %p1682_p1, %p1959_p6 }
  0xff   : > { %p1673_p3 = pneg %p1672_p2 }
 0x101   : > { %1865 = dma.done.wait (%p1673_p3), %s1518_s29, 512  }
 0x102   : > { %1867 = vsyncadd (%p1673_p3), %s1518_s29, 4294966784  ;;  %s1528_s16 = scalar_lea.sflag [#allocation9], %s1517_s9 }
 0x103   : > { %1869 = dma.done.wait (%p1673_p3), %s1528_s16, 512  }
 0x104   : > { %1871 = vsyncadd (%p1673_p3), %s1528_s16, 4294966784  ;;  %p19_p5 = scmp.ge.s32.totalorder %s1942_s18, 4   ;;  %s2551_s12 = smov %s1878_s13 }
 0x105   : > { %s2552_s13 = smov %s1882_s14  ;;  %s2553_s14 = smov %s1953_s21 }
 0x106   : > { %s2554_s15 = smov %s1942_s18  ;;  %21 = sbr.rel (!%p19_p5) target bundleno = 7 (0x7), region = 86 }
 0x10b   :  { %1534 = vsyncpa [#allocation3], 1 }
 0x10c   :  { %1536 = vsyncpa [#allocation3 + $0x1], 1 }
 0x10d   :  { %1537 = vsyncpa [#allocation6], 1 }
 0x10e   :  { %1538 = vsyncpa [#allocation4], 1 }
 0x10f   :  { %1540 = vsyncpa [#allocation4 + $0x1], 1 }
 0x110   :  { %1541 = vsyncpa [#allocation9], 1 }
 0x111   :  { %1543 = vsyncpa [#allocation9 + $0x1], 1 }

</bundles_post_ra>
